<compile_context>
chip_gen: v6e
topology: v6e:2x2x1
jax: 0.10.0
libtpu: 0.0.40
codegen_flags: <defaults>
</compile_context>

<pallas_src>
import functools

import jax
import jax.numpy as jnp
from jax import lax
from jax.experimental import pallas as pl
from jax.experimental.pallas import tpu as pltpu


def _round_up(n, m):
    return ((n + m - 1) // m) * m


def _cdiv(a, b):
    return (a + b - 1) // b


def _mlp_kernel(x_ref, ymax_ref,
                w1_ref, b1_ref, w2_ref, b2_ref, w3_ref, b3_ref,
                o_ref):
    # x_ref: (tile, 5) batch-major block straight from HBM (1/x_max already
    # folded into w1).  First layer contracts the last dim of both operands
    # so everything downstream is lane-dense (features, batch).
    h = lax.dot_general(
        w1_ref[...], x_ref[...],
        dimension_numbers=(((1,), (1,)), ((), ())),
        preferred_element_type=jnp.float32) + b1_ref[...]            # (10, tile)
    h = jnp.maximum(h, 0.0)

    h = jnp.dot(w2_ref[...], h,
                preferred_element_type=jnp.float32) + b2_ref[...]    # (10, tile)
    h = jnp.maximum(h, 0.0)

    h = jnp.dot(w3_ref[...], h,
                preferred_element_type=jnp.float32) + b3_ref[...]    # (2, tile)
    o_ref[...] = jnp.tanh(h) * ymax_ref[...]                         # (2, tile)


def _choose_tile(batch, max_tile):
    """Pick a batch tile: multiple of 128, balanced steps, >=2 steps when there
    is enough work (v7x megacore).  For small batches use a single exact block
    (block dims equal to the full array dims are always legal)."""
    max_tile = max(128, (max_tile // 128) * 128)
    if batch <= 256:
        return batch, 1
    n_steps = max(2, _cdiv(batch, max_tile))
    tile = _round_up(_cdiv(batch, n_steps), 128)
    return tile, _cdiv(batch, tile)


@functools.partial(jax.jit, static_argnames=("max_tile",))
def neural_network_forward(x, kernel_params, max_tile=16384):
    """x: (B, 5) float32 raw (un-normalized) inputs.  Returns (B, 2) float32."""
    ymaxc, w1f_t, b1c, w2t, b2c, w3t, b3c = kernel_params
    B = x.shape[0]
    if B == 0:
        return jnp.zeros((0, 2), jnp.float32)
    x = x.astype(jnp.float32)

    tile, n_steps = _choose_tile(B, max_tile)

    # Weights / biases / y_max stay VMEM-resident across grid steps.
    def resident(a):
        return pl.BlockSpec(a.shape, lambda i: (0, 0))

    out_t = pl.pallas_call(
        _mlp_kernel,
        out_shape=jax.ShapeDtypeStruct((2, B), jnp.float32),
        grid=(n_steps,),
        in_specs=[
            pl.BlockSpec((tile, 5), lambda i: (i, 0)),   # streamed x tile
            resident(ymaxc),
            resident(w1f_t), resident(b1c),
            resident(w2t), resident(b2c),
            resident(w3t), resident(b3c),
        ],
        out_specs=pl.BlockSpec((2, tile), lambda i: (0, i)),
        compiler_params=pltpu.CompilerParams(
            dimension_semantics=("parallel",),
            vmem_limit_bytes=48 * 1024 * 1024,
        ),
        cost_estimate=pl.CostEstimate(
            flops=340 * B, transcendentals=2 * B, bytes_accessed=28 * B),
    )(x, ymaxc, w1f_t, b1c, w2t, b2c, w3t, b3c)

    # Keep the module's (B, 2) contract.  This is a tiny 8 B/row relayout of the
    # 2-wide output; consumers that can accept (2, B) should use out_t directly.
    return out_t.T


def init_params(key):
    """Deterministic init mimicking nn.Linear's uniform(-1/sqrt(fan_in), +) init.

    Returns the 'logical' (PyTorch-equivalent) parameters:
      (x_max(1,5), y_max(1,2), w1(5,10), b1(1,10), w2(10,10), b2(1,10), w3(10,2), b3(1,2))
    with weights stored as (in_features, out_features).
    """
    ks = jax.random.split(key, 6)

    def linear(kw, kb, fan_in, fan_out):
        bound = 1.0 / jnp.sqrt(jnp.float32(fan_in))
        w = jax.random.uniform(kw, (fan_in, fan_out), jnp.float32, -bound, bound)
        b = jax.random.uniform(kb, (1, fan_out), jnp.float32, -bound, bound)
        return w, b

    w1, b1 = linear(ks[0], ks[1], 5, 10)
    w2, b2 = linear(ks[2], ks[3], 10, 10)
    w3, b3 = linear(ks[4], ks[5], 10, 2)

    xmax = jnp.array([[1920.0, 1080.0, 1920.0, 1080.0, 20.0]], dtype=jnp.float32)
    ymax = jnp.array([[10.0, 10.0]], dtype=jnp.float32)
    return (xmax, ymax, w1, b1, w2, b2, w3, b3)


def prepare_kernel_params(params):
    """Fold 1/x_max into w1 and transpose everything into the
    (out_features, in_features) / column-bias layout the kernel expects."""
    xmax, ymax, w1, b1, w2, b2, w3, b3 = params
    inv_xmax = (1.0 / xmax).reshape(5, 1)          # (5, 1)
    w1f_t = (w1 * inv_xmax).T                      # (10, 5), normalization folded in
    b1c = b1.reshape(10, 1)
    w2t = w2.T                                     # (10, 10)
    b2c = b2.reshape(10, 1)
    w3t = w3.T                                     # (2, 10)
    b3c = b3.reshape(2, 1)
    ymaxc = ymax.reshape(2, 1)
    return (ymaxc, w1f_t, b1c, w2t, b2c, w3t, b3c)


def reference_forward(x, params):
    xmax, ymax, w1, b1, w2, b2, w3, b3 = params
    h = x / xmax
    h = jnp.maximum(h @ w1 + b1, 0.0)
    h = jnp.maximum(h @ w2 + b2, 0.0)
    h = jnp.tanh(h @ w3 + b3)
    return h * ymax


if __name__ == "__main__":
    key = jax.random.PRNGKey(0)
    kx, kp = jax.random.split(key)

    params = init_params(kp)
    kparams = prepare_kernel_params(params)

    # synthetic "raw" inputs on the x_max scale: [px, px, px, px, speed]
    scales = jnp.array([1920.0, 1080.0, 1920.0, 1080.0, 20.0], dtype=jnp.float32)

    # Small demo batch (single exact block) plus a batch that exercises the
    # tiled path with a ragged boundary block.
    for B in (8, 300):
        xb = jax.random.uniform(jax.random.fold_in(kx, B), (B, 5), jnp.float32) * scales
        out = jax.block_until_ready(neural_network_forward(xb, kparams))
        ref = reference_forward(xb, params)
        assert out.shape == (B, 2), out.shape
        assert jnp.allclose(out, ref, atol=1e-4, rtol=1e-4), (B, out, ref)

    print("KERNEL_OK")
</pallas_src>

<mosaic_0001>
module attributes {stable_mosaic.version = 11 : i64} {
  func.func @_mlp_kernel(%arg0: i32, %arg1: memref<8x5xf32, #tpu.memory_space<vmem>>, %arg2: memref<2x1xf32, #tpu.memory_space<vmem>>, %arg3: memref<10x5xf32, #tpu.memory_space<vmem>>, %arg4: memref<10x1xf32, #tpu.memory_space<vmem>>, %arg5: memref<10x10xf32, #tpu.memory_space<vmem>>, %arg6: memref<10x1xf32, #tpu.memory_space<vmem>>, %arg7: memref<2x10xf32, #tpu.memory_space<vmem>>, %arg8: memref<2x1xf32, #tpu.memory_space<vmem>>, %arg9: memref<2x8xf32, #tpu.memory_space<vmem>>) attributes {dimension_semantics = [#tpu.dimension_semantics<parallel>], iteration_bounds = array<i64: 1>, scalar_prefetch = 0 : i64, scratch_operands = 0 : i64, tpu.core_type = #tpu.core_type<tc>, window_params = [{transform_indices = @transform_0, window_bounds = array<i64: 8, 5>}, {pipeline_mode = #tpu.pipeline_mode<synchronous>, transform_indices = @transform_1, window_bounds = array<i64: 2, 1>}, {pipeline_mode = #tpu.pipeline_mode<synchronous>, transform_indices = @transform_2, window_bounds = array<i64: 10, 5>}, {pipeline_mode = #tpu.pipeline_mode<synchronous>, transform_indices = @transform_3, window_bounds = array<i64: 10, 1>}, {pipeline_mode = #tpu.pipeline_mode<synchronous>, transform_indices = @transform_4, window_bounds = array<i64: 10, 10>}, {pipeline_mode = #tpu.pipeline_mode<synchronous>, transform_indices = @transform_5, window_bounds = array<i64: 10, 1>}, {pipeline_mode = #tpu.pipeline_mode<synchronous>, transform_indices = @transform_6, window_bounds = array<i64: 2, 10>}, {pipeline_mode = #tpu.pipeline_mode<synchronous>, transform_indices = @transform_7, window_bounds = array<i64: 2, 1>}, {transform_indices = @transform_8, window_bounds = array<i64: 2, 8>}]} {
    %c0 = arith.constant 0 : index
    %c0_0 = arith.constant 0 : index
    %0 = vector.load %arg3[%c0, %c0_0] : memref<10x5xf32, #tpu.memory_space<vmem>>, vector<10x5xf32>
    %c0_1 = arith.constant 0 : index
    %c0_2 = arith.constant 0 : index
    %1 = vector.load %arg1[%c0_1, %c0_2] : memref<8x5xf32, #tpu.memory_space<vmem>>, vector<8x5xf32>
    %cst = arith.constant dense<0.000000e+00> : vector<10x8xf32>
    %2 = tpu.matmul %0, %1, %cst {dimension_numbers = #tpu.dot_dimension_numbers<[1], [1], [0], [0], [0, 0, 1, 0], [], []>} : vector<10x5xf32>, vector<8x5xf32>, vector<10x8xf32> -> vector<10x8xf32>
    %c0_3 = arith.constant 0 : index
    %c0_4 = arith.constant 0 : index
    %3 = vector.load %arg4[%c0_3, %c0_4] : memref<10x1xf32, #tpu.memory_space<vmem>>, vector<10x1xf32>
    %4 = vector.broadcast %3 : vector<10x1xf32> to vector<10x8xf32>
    %5 = arith.addf %2, %4 : vector<10x8xf32>
    %cst_5 = arith.constant 0.000000e+00 : f32
    %6 = vector.broadcast %cst_5 : f32 to vector<10x8xf32>
    %7 = arith.maximumf %5, %6 : vector<10x8xf32>
    %c0_6 = arith.constant 0 : index
    %c0_7 = arith.constant 0 : index
    %8 = vector.load %arg5[%c0_6, %c0_7] : memref<10x10xf32, #tpu.memory_space<vmem>>, vector<10x10xf32>
    %cst_8 = arith.constant dense<0.000000e+00> : vector<10x8xf32>
    %9 = tpu.matmul %8, %7, %cst_8 {dimension_numbers = #tpu.dot_dimension_numbers<[1], [0], [0], [1], [0, 0, 1, 1], [], []>} : vector<10x10xf32>, vector<10x8xf32>, vector<10x8xf32> -> vector<10x8xf32>
    %c0_9 = arith.constant 0 : index
    %c0_10 = arith.constant 0 : index
    %10 = vector.load %arg6[%c0_9, %c0_10] : memref<10x1xf32, #tpu.memory_space<vmem>>, vector<10x1xf32>
    %11 = vector.broadcast %10 : vector<10x1xf32> to vector<10x8xf32>
    %12 = arith.addf %9, %11 : vector<10x8xf32>
    %cst_11 = arith.constant 0.000000e+00 : f32
    %13 = vector.broadcast %cst_11 : f32 to vector<10x8xf32>
    %14 = arith.maximumf %12, %13 : vector<10x8xf32>
    %c0_12 = arith.constant 0 : index
    %c0_13 = arith.constant 0 : index
    %15 = vector.load %arg7[%c0_12, %c0_13] : memref<2x10xf32, #tpu.memory_space<vmem>>, vector<2x10xf32>
    %cst_14 = arith.constant dense<0.000000e+00> : vector<2x8xf32>
    %16 = tpu.matmul %15, %14, %cst_14 {dimension_numbers = #tpu.dot_dimension_numbers<[1], [0], [0], [1], [0, 0, 1, 1], [], []>} : vector<2x10xf32>, vector<10x8xf32>, vector<2x8xf32> -> vector<2x8xf32>
    %c0_15 = arith.constant 0 : index
    %c0_16 = arith.constant 0 : index
    %17 = vector.load %arg8[%c0_15, %c0_16] : memref<2x1xf32, #tpu.memory_space<vmem>>, vector<2x1xf32>
    %18 = vector.broadcast %17 : vector<2x1xf32> to vector<2x8xf32>
    %19 = arith.addf %16, %18 : vector<2x8xf32>
    %20 = math.tanh %19 : vector<2x8xf32>
    %c0_17 = arith.constant 0 : index
    %c0_18 = arith.constant 0 : index
    %21 = vector.load %arg2[%c0_17, %c0_18] : memref<2x1xf32, #tpu.memory_space<vmem>>, vector<2x1xf32>
    %22 = vector.broadcast %21 : vector<2x1xf32> to vector<2x8xf32>
    %23 = arith.mulf %20, %22 : vector<2x8xf32>
    %c0_19 = arith.constant 0 : index
    %c0_20 = arith.constant 0 : index
    %24 = vector.load %arg9[%c0_19, %c0_20] : memref<2x8xf32, #tpu.memory_space<vmem>>, vector<2x8xf32>
    tpu.vector_store %arg9[%c0_19, %c0_20], %23 {strides = array<i32>} : memref<2x8xf32, #tpu.memory_space<vmem>>, vector<2x8xf32>,
    return
  }
  func.func @transform_0(%arg0: i32) -> (i32, i32) {
    %c0_i32 = arith.constant 0 : i32
    %c0_i32_0 = arith.constant 0 : i32
    return %arg0, %c0_i32 : i32, i32
  }
  func.func @transform_1(%arg0: i32) -> (i32, i32) {
    %c0_i32 = arith.constant 0 : i32
    %c0_i32_0 = arith.constant 0 : i32
    %c0_i32_1 = arith.constant 0 : i32
    return %c0_i32, %c0_i32_0 : i32, i32
  }
  func.func @transform_2(%arg0: i32) -> (i32, i32) {
    %c0_i32 = arith.constant 0 : i32
    %c0_i32_0 = arith.constant 0 : i32
    %c0_i32_1 = arith.constant 0 : i32
    return %c0_i32, %c0_i32_0 : i32, i32
  }
  func.func @transform_3(%arg0: i32) -> (i32, i32) {
    %c0_i32 = arith.constant 0 : i32
    %c0_i32_0 = arith.constant 0 : i32
    %c0_i32_1 = arith.constant 0 : i32
    return %c0_i32, %c0_i32_0 : i32, i32
  }
  func.func @transform_4(%arg0: i32) -> (i32, i32) {
    %c0_i32 = arith.constant 0 : i32
    %c0_i32_0 = arith.constant 0 : i32
    %c0_i32_1 = arith.constant 0 : i32
    return %c0_i32, %c0_i32_0 : i32, i32
  }
  func.func @transform_5(%arg0: i32) -> (i32, i32) {
    %c0_i32 = arith.constant 0 : i32
    %c0_i32_0 = arith.constant 0 : i32
    %c0_i32_1 = arith.constant 0 : i32
    return %c0_i32, %c0_i32_0 : i32, i32
  }
  func.func @transform_6(%arg0: i32) -> (i32, i32) {
    %c0_i32 = arith.constant 0 : i32
    %c0_i32_0 = arith.constant 0 : i32
    %c0_i32_1 = arith.constant 0 : i32
    return %c0_i32, %c0_i32_0 : i32, i32
  }
  func.func @transform_7(%arg0: i32) -> (i32, i32) {
    %c0_i32 = arith.constant 0 : i32
    %c0_i32_0 = arith.constant 0 : i32
    %c0_i32_1 = arith.constant 0 : i32
    return %c0_i32, %c0_i32_0 : i32, i32
  }
  func.func @transform_8(%arg0: i32) -> (i32, i32) {
    %c0_i32 = arith.constant 0 : i32
    %c0_i32_0 = arith.constant 0 : i32
    return %c0_i32, %arg0 : i32, i32
  }
}

</mosaic_0001>

<bundles_post_ra>
// kernel: neural_network_forward.1
= control target key start
LH: loop header
LB: loop body
LE: loop exit
PB: predicated region body
PF: predicated region fallthrough
CT: control target
= control target key end

     0   :  { %vm45_vm0 = vcmask 39936   ;;  %v408_v4 = vmov 0   ;;  %s502_s0 = inlined_call_operand.vmem [shape: f32[8,5], index: 0, kind: input, shape index: {}]   ;;  %s503_s1 = inlined_call_operand.vmem [shape: f32[2,1], index: 1, kind: input, shape index: {}]   ;;  %s504_s2 = inlined_call_operand.vmem [shape: f32[10,5], index: 2, kind: input, shape index: {}]   ;;  %s505_s3 = inlined_call_operand.vmem [shape: f32[10,1], index: 3, kind: input, shape index: {}]   ;;  %s506_s4 = inlined_call_operand.vmem [shape: f32[10,10], index: 4, kind: input, shape index: {}]   ;;  %s507_s5 = inlined_call_operand.vmem [shape: f32[10,1], index: 5, kind: input, shape index: {}]   ;;  %s508_s6 = inlined_call_operand.vmem [shape: f32[2,10], index: 6, kind: input, shape index: {}]   ;;  %s509_s7 = inlined_call_operand.vmem [shape: f32[2,1], index: 7, kind: input, shape index: {}]   ;;  %s510_s8 = inlined_call_operand.hbm [shape: f32[2,8], index: 8, kind: output, shape index: {}]  }
   0x1   :  { %v32_v0 = vld [vmem:[%s502_s0] sm:$0xff]  ;;  %v34_v2 = vld [vmem:[%s505_s3 + $0x8] sm:$0x3]  ;;  %382 = vset.pattern.permute.xlu0 %v408_v4 }
   0x2   :  { %v30_v1 = vld [vmem:[%s504_s2] sm:$0xff]  ;;  %359 = vmatprep.subr.msk.mxu0 %vm45_vm0, %v32_v0  ;;  %v31_v3 = vld [vmem:[%s504_s2 + $0x8] sm:$0x3] }
   0x3   :  { %361 = vmatprep.mubr.msk.f32.mxu0 %vm45_vm0, %v30_v1  ;;  %360 = vmatpush3.xpose.msk.msra.mxu0 %vm45_vm0, %v32_v0 }
   0x4   :  { %13 = vsyncpa [#allocation3], 0  ;;  %42 = vperm.xlu0 %382, %v34_v2   ;;  %383 = vset.pattern.permute.xlu1 %v408_v4  ;;  %v33_v5 = vld [vmem:[%s505_s3] sm:$0xff]  ;;  %vm146_vm1 = vcmask 80896   ;;  %v135_v8 = vld [vmem:[%s507_s5 + $0x8] sm:$0x3] }
   0x5   :  { %v235_v6 = vld [vmem:[%s509_s7] sm:$0x3]  ;;  %143 = vperm.xlu1 %383, %v135_v8   ;;  %vm153_vm2 = vcmask 1041408   ;;  %v133_v19 = vld [vmem:[%s506_s4 + $0x8] sm:$0x3]  ;;  %v409_v20 = vmov 0.0  }
   0x6   :  { %362 = vmatmul.mubr.msk.f32.vlgmr.msra.gmra.mxu0 %vm45_vm0, %v31_v3  ;;  %v132_v7 = vld [vmem:[%s506_s4] sm:$0xff]  ;;  %371 = vmatprep.subr.mxu0 %v409_v20  ;;  %vm410_vm3 = vmmov 0   ;;  %s411_s22 = smov [#allocation2]   ;;  %vm325_vm4 = vcmask 58368  }
   0x7   :  { %368 = vmatprep.mubr.msk.f32.mxu1 %vm146_vm1, %v132_v7  ;;  %v134_v9 = vld [vmem:[%s507_s5] sm:$0xff]  ;;  %375 = vmatprep.mubr.msk.f32.mxu0 %vm410_vm3, %v409_v20  ;;  %s333_s23 = sshll.u32 %s411_s22, 4  ;;  %s334_s23 = int_to_ptr.vmem [resolvable:$true] %s333_s23 }
   0x8   :  { %37 = vperm.xlu0 %382, %v33_v5   ;;  %v318_v10 = vld [vmem:[%s503_s1] sm:$0x3]  ;;  %s386_s24 = scalar_lea.vmem %s334_s23, 32  ;;  %p391_p1 = scmp.lt.s32.totalorder %s334_s23, %s334_s23 }
   0x9   :  { %138 = vperm.xlu1 %383, %v134_v9   ;;  %v234_v29 = vld [vmem:[%s508_s6] sm:$0x3]  ;;  %p387_p0 = scmp.ne.s32.totalorder %s334_s23, %s386_s24  ;;  %p392_p2 = scmp.lt.s32.totalorder %s386_s24, %s386_s24 }
   0xb   :  { %p393_p3 = por %p392_p2, %p391_p1 }
   0xc   :  { %238 = vperm.xlu0 %382, %v235_v6  }
   0xd   :  { %321 = vperm.xlu1 %383, %v318_v10   ;;  %p394_p4 = pnand %p393_p3, %p387_p0 }
  0x7f   :  { %v43_v11 = vpop.permute.xlu0 %42 }
  0x80   :  { %v144_v21 = vpop.permute.xlu1 %143 }
  0x83   :  { %v38_v14 = vpop.permute.xlu0 %37 }
  0x84   :  { %v139_v24 = vpop.permute.xlu1 %138 }
  0x87   :  { %v239_v30 = vpop.permute.xlu0 %238 }
  0x88   :  { %v322_v35 = vpop.permute.xlu1 %321 }
  0xc6   :  { %v363_v12 = vpop.f32.mrf.mxu0 }
  0xc7   :  { %v127_v13 = vadd.f32 %v363_v12, %v43_v11 }
  0xc8   :  { %v121_v15 = vpop.f32.mrf.mxu0 }
  0xc9   :  { %v131_v16 = vmax.f32 %v127_v13, 0.0  ;;  %v122_v17 = vadd.f32 %v121_v15, %v38_v14 }
  0xcb   :  { %v130_v18 = vmax.f32 %v122_v17, 0.0  ;;  %364 = vmatprep.subr.msk.mxu1 %vm153_vm2, %v131_v16 }
  0xcc   :  { %365 = vmatpush3.msk.msra.mxu1 %vm153_vm2, %v131_v16 }
  0xcd   :  { %366 = vmatprep.subr.mxu1 %v130_v18 }
  0xce   :  { %367 = vmatpush3.msra.mxu1 %v130_v18 }
  0xcf   :  { %369 = vmatmul.mubr.msk.f32.vlgmr.msra.gmra.mxu1 %vm146_vm1, %v133_v19 }
 0x18f   :  { %v370_v22 = vpop.f32.mrf.mxu1 }
 0x190   :  { %v229_v23 = vadd.f32 %v370_v22, %v144_v21 }
 0x191   :  { %v223_v25 = vpop.f32.mrf.mxu1 }
 0x192   :  { %v233_v26 = vmax.f32 %v229_v23, 0.0  ;;  %v224_v27 = vadd.f32 %v223_v25, %v139_v24 }
 0x194   :  { %v232_v28 = vmax.f32 %v224_v27, 0.0  ;;  %372 = vmatpush3.msk.msra.mxu0 %vm153_vm2, %v233_v26 }
 0x195   :  { %373 = vmatprep.subr.mxu0 %v409_v20 }
 0x196   :  { %374 = vmatpush3.msra.mxu0 %v232_v28 }
 0x197   :  { %376 = vmatmul.mubr.msk.f32.vlgmr.msra.gmra.mxu0 %vm146_vm1, %v234_v29 }
 0x257   :  { %v313_v31 = vpop.f32.mrf.mxu0 }
 0x258   :  { %v314_v32 = vadd.f32 %v313_v31, %v239_v30 }
 0x259   :  { %v377_v33 = vpop.f32.mrf.mxu0 }
 0x25a   :  { %384 = vtanh.f32 %v314_v32 }
 0x267   :  { %v385_v34 = vpop.eup %384 }
 0x268   :  { %v324_v36 = vmul.f32 %v385_v34, %v322_v35 }
 0x26a   :  { %326 = vst.msk [vmem:[#allocation2] sm:$0x3] %vm325_vm4, %v324_v36 }
 0x26b   :  { %397 = shalt.err (!%p394_p4)
}
 0x26c   :  { %336 = dma.vmem_to_hbm [thread:$0]  %s334_s23, 32, %s510_s8, [#allocation3]  }
 0x26d   :  { %406 = dma.done.wait [#allocation3], 32  }
 0x26e   :  { %407 = vsyncadd [#allocation3], 4294967264 }
 0x26f   :  { %340 = vsyncpa [#allocation3], 1 }

</bundles_post_ra>
